<compile_context>
chip_gen: v5e
topology: v5e:2x2
jax: 0.10.0
libtpu: 0.0.40
codegen_flags: <defaults>
</compile_context>

<pallas_src>
import math

import jax
import jax.numpy as jnp
from jax.experimental import pallas as pl
from jax.experimental.pallas import tpu as pltpu


def _make_kernel(K, D, topics_per_chunk):
    KD = K * D
    n_chunks = -(-K // topics_per_chunk)

    def kernel(embT_ref, idiag_ref, mall_lin_ref, exp_ltc_ref, rowmax_ref, x_ref):
        # embT_ref    : (D, TV)        transposed vocab tile (vocab on lanes), matmul dtype
        # idiag_ref   : (K, D)         1 / exp(log_diag) per topic, matmul dtype
        # mall_lin_ref: (K*D + K, D)   [stacked M_k ; -2 * Sigma^{-1} mu], matmul dtype
        # exp_ltc_ref : (B, K)         exp(log_theta + const_k - rowmax_b), f32
        # rowmax_ref  : (B, 1)         per-row max of (log_theta + const_k), f32
        # x_ref       : (B, TV)        output tile
        f32 = jnp.float32
        emb = embT_ref[...]                                               # (D, TV)
        emb2 = emb * emb                                                  # VPU

        # diag part of the quadratic form: idiag . e^2                     (K, TV)
        quad_diag = jnp.dot(idiag_ref[...], emb2, preferred_element_type=f32)

        if n_chunks == 1:
            # single fused matmul: [M_1..M_K ; lin] @ emb                 (K*D+K, TV)
            big = jnp.dot(mall_lin_ref[...], emb, preferred_element_type=f32)
            y = big[:KD]                                                  # (K*D, TV)
            lin_term = big[KD:]                                           # (K, TV)
            wsum = jnp.sum((y * y).reshape(K, D, y.shape[-1]), axis=1)    # (K, TV)
        else:
            # topic-chunked whitening matmul (caps the (rows, TV) intermediate)
            parts = []
            for c in range(n_chunks):
                k0 = c * topics_per_chunk
                k1 = min(K, k0 + topics_per_chunk)
                y_c = jnp.dot(mall_lin_ref[k0 * D:k1 * D, :], emb,
                              preferred_element_type=f32)                 # (nc*D, TV)
                parts.append(
                    jnp.sum((y_c * y_c).reshape(k1 - k0, D, y_c.shape[-1]), axis=1))
            wsum = jnp.concatenate(parts, axis=0)                         # (K, TV)
            lin_term = jnp.dot(mall_lin_ref[KD:, :], emb,
                               preferred_element_type=f32)                # (K, TV)

        # -0.5 * Mahalanobis (per-topic constants are folded into exp_ltc host-side)
        nh = -0.5 * (quad_diag + lin_term - wsum)                         # (K, TV) f32

        # logsumexp over topics, matmul form (flash-style double max shift):
        #   x = rowmax_b + m_v + log( sum_k exp(ltc - rowmax_b) * exp(nh - m_v) )
        m_v = jnp.max(nh, axis=0, keepdims=True)                          # (1, TV)
        p = jnp.exp(nh - m_v)                                             # (K, TV) f32, EUP
        s = jnp.dot(exp_ltc_ref[...], p, preferred_element_type=f32)      # (B, TV)
        x = rowmax_ref[...] + m_v + jnp.log(s)                            # (B, TV)
        x_ref[...] = x.astype(x_ref.dtype)

    return kernel


def decoder_tntm_forward(theta_hat, embeddings, mus, L_lower, log_diag, *,
                         tile_v=512, matmul_dtype=jnp.bfloat16):
    """Pallas implementation of Decoder_TNTM.forward(theta_hat)."""
    f32 = jnp.float32
    B, K = theta_hat.shape
    V, D = embeddings.shape
    assert mus.shape == (K, D)
    assert L_lower.shape == (K, D, D)
    assert log_diag.shape == (K, D)

    mus = mus.astype(f32)
    W = L_lower.astype(f32)                  # full matrix is the cov_factor (as in PyTorch)
    log_diag = log_diag.astype(f32)

    # ---- small per-topic linear algebra (plain JAX glue, Woodbury factors) ----
    inv_diag = jnp.exp(-log_diag)                                    # (K, D) = 1/diag
    Wt_Dinv = jnp.transpose(W, (0, 2, 1)) * inv_diag[:, None, :]     # (K, D, D) = W^T D^{-1}
    cap = jnp.einsum('krd,kdm->krm', Wt_Dinv, W) + jnp.eye(D, dtype=f32)[None]
    L_cap = jnp.linalg.cholesky(cap)                                 # (K, D, D)
    # M_k = L_cap_k^{-1} W_k^T D_k^{-1};  Sigma_k^{-1} = D^{-1} - M_k^T M_k
    M = jax.vmap(
        lambda L, A: jax.scipy.linalg.solve_triangular(L, A, lower=True)
    )(L_cap, Wt_Dinv)                                                # (K, D, D)

    Mmu = jnp.einsum('krc,kc->kr', M, mus)                           # (K, D)
    sinv_mu = inv_diag * mus - jnp.einsum('krc,kr->kc', M, Mmu)      # (K, D) = Sigma^{-1} mu
    lin = -2.0 * sinv_mu                                             # (K, D)
    quad_const = jnp.sum(mus * sinv_mu, axis=-1)                     # (K,)
    logdet = (2.0 * jnp.sum(jnp.log(jnp.diagonal(L_cap, axis1=-2, axis2=-1)), -1)
              + jnp.sum(log_diag, -1))                               # (K,)
    const = -0.5 * (D * math.log(2.0 * math.pi) + logdet + quad_const)

    log_theta = jax.nn.log_softmax(theta_hat.astype(f32), axis=-1)   # (B, K)
    ltc = log_theta + const[None, :]                                 # (B, K)
    rowmax = jnp.max(ltc, axis=-1, keepdims=True)                    # (B, 1)  overflow guard
    exp_ltc = jnp.exp(ltc - rowmax)                                  # (B, K)  f32

    # ---- operand packing / casts (matmul operands only) ----------------------
    mall_lin = jnp.concatenate([M.reshape(K * D, D), lin], axis=0)   # (K*D+K, D)
    mall_lin = mall_lin.astype(matmul_dtype)
    idiag = inv_diag.astype(matmul_dtype)

    # ---- vocab tiling: lane-aligned, zero-padded, >= 2 grid steps if possible --
    lanes = -(-V // 128)                                             # 128-lane groups
    tiles_per_step = max(1, min(max(tile_v, 128) // 128, -(-lanes // 4)))
    tile_v = tiles_per_step * 128
    n_steps = -(-(lanes * 128) // tile_v)
    V_pad = n_steps * tile_v

    embT = jnp.transpose(embeddings.astype(f32))                     # (D, V) lane-dense
    if V_pad > V:
        embT = jnp.pad(embT, ((0, 0), (0, V_pad - V)))               # padded cols -> sliced off
    embT = embT.astype(matmul_dtype)

    # whitening matmul topic chunking (caps the (rows, tile_v) f32 intermediate)
    topics_per_chunk = max(1, min(K, 2048 // max(D, 1)))
    kernel = _make_kernel(K, D, topics_per_chunk)

    itemsize = jnp.dtype(matmul_dtype).itemsize
    est_vmem = (2 * D * tile_v * itemsize                            # embT (double-buffered)
                + 2 * B * tile_v * 4                                 # out (double-buffered)
                + 2 * (topics_per_chunk * D + 4 * K) * tile_v * 4    # y chunk + K,TV temps
                + 2 * ((K * D + K) * D + K * D) * itemsize           # mall_lin + idiag
                + 2 * B * (K + 1) * 4)                               # exp_ltc + rowmax
    vmem_limit = int(min(64 * 1024 * 1024, max(32 * 1024 * 1024, 2 * est_vmem)))

    out = pl.pallas_call(
        kernel,
        out_shape=jax.ShapeDtypeStruct((B, V_pad), theta_hat.dtype),
        grid_spec=pltpu.PrefetchScalarGridSpec(
            num_scalar_prefetch=0,
            grid=(n_steps,),
            in_specs=[
                pl.BlockSpec((D, tile_v), lambda i: (0, i)),          # embeddings^T tile
                pl.BlockSpec((K, D), lambda i: (0, 0)),               # 1/diag
                pl.BlockSpec((K * D + K, D), lambda i: (0, 0)),       # [stacked M_k ; lin]
                pl.BlockSpec((B, K), lambda i: (0, 0)),               # exp(ltc - rowmax)
                pl.BlockSpec((B, 1), lambda i: (0, 0)),               # rowmax
            ],
            out_specs=pl.BlockSpec((B, tile_v), lambda i: (0, i)),
        ),
        compiler_params=pltpu.CompilerParams(
            dimension_semantics=("parallel",),
            vmem_limit_bytes=vmem_limit,
        ),
    )(embT, idiag, mall_lin, exp_ltc, rowmax)

    return out[:, :V]


def decoder_tntm_reference(theta_hat, embeddings, mus, L_lower, log_diag):
    """Independent dense-covariance reference (plain JAX)."""
    K, D = mus.shape
    diag = jnp.exp(log_diag)
    cov = jnp.einsum('kij,klj->kil', L_lower, L_lower) + jax.vmap(jnp.diag)(diag)
    sign, logdet = jnp.linalg.slogdet(cov)
    cinv = jnp.linalg.inv(cov)
    diff = embeddings[None, :, :] - mus[:, None, :]                  # (K, V, D)
    mahal = jnp.einsum('kvd,kde,kve->kv', diff, cinv, diff)          # (K, V)
    log_beta = -0.5 * (D * math.log(2.0 * math.pi) + logdet[:, None] + mahal)
    log_theta = jax.nn.log_softmax(theta_hat, axis=-1)               # (B, K)
    A = log_beta[None, :, :] + log_theta[:, :, None]                 # (B, K, V)
    return jax.scipy.special.logsumexp(A, axis=1)                    # (B, V)


if __name__ == "__main__":
    # Small, shape-consistent synthetic setup:
    #   batch = 2, n_topics = 8, vocab_size = 256, embedding_dim = 32
    B, K, V, D = 2, 8, 256, 32
    key = jax.random.PRNGKey(0)
    k_emb, k_mu, k_L, k_diag, k_theta = jax.random.split(key, 5)

    embeddings = jax.random.normal(k_emb, (V, D), dtype=jnp.float32)
    mus_init = jax.random.normal(k_mu, (K, D), dtype=jnp.float32)
    L_lower_init = 0.1 * jax.random.normal(k_L, (K, D, D), dtype=jnp.float32)
    log_diag_init = 0.1 * jax.random.normal(k_diag, (K, D), dtype=jnp.float32)
    theta_hat = jax.random.normal(k_theta, (B, K), dtype=jnp.float32)

    ref = jax.block_until_ready(
        decoder_tntm_reference(theta_hat, embeddings, mus_init,
                               L_lower_init, log_diag_init))

    # f32-operand path: tight check against the dense-covariance reference.
    out_f32 = jax.block_until_ready(
        decoder_tntm_forward(theta_hat, embeddings, mus_init, L_lower_init,
                             log_diag_init, matmul_dtype=jnp.float32))
    assert out_f32.shape == (B, V) and out_f32.dtype == jnp.float32
    assert bool(jnp.all(jnp.isfinite(out_f32)))
    assert jnp.allclose(out_f32, ref, rtol=1e-3, atol=5e-2), (
        float(jnp.max(jnp.abs(out_f32 - ref))))

    # bf16-operand path (default, perf path): f32 accumulation; looser tolerance
    # since |x| is O(60) and bf16 operands carry ~3e-3 relative error.
    out_bf16 = jax.block_until_ready(
        decoder_tntm_forward(theta_hat, embeddings, mus_init, L_lower_init,
                             log_diag_init, matmul_dtype=jnp.bfloat16))
    assert out_bf16.shape == (B, V) and out_bf16.dtype == jnp.float32
    assert bool(jnp.all(jnp.isfinite(out_bf16)))
    assert jnp.allclose(out_bf16, ref, rtol=5e-3, atol=2.5e-1), (
        float(jnp.max(jnp.abs(out_bf16 - ref))))

    print("KERNEL_OK")
</pallas_src>

<mosaic_0001>
module attributes {stable_mosaic.version = 11 : i64} {
  func.func @kernel(%arg0: i32, %arg1: memref<32x128xf32, #tpu.memory_space<vmem>>, %arg2: memref<8x32xf32, #tpu.memory_space<vmem>>, %arg3: memref<264x32xf32, #tpu.memory_space<vmem>>, %arg4: memref<2x8xf32, #tpu.memory_space<vmem>>, %arg5: memref<2x1xf32, #tpu.memory_space<vmem>>, %arg6: memref<2x128xf32, #tpu.memory_space<vmem>>) attributes {dimension_semantics = [#tpu.dimension_semantics<parallel>], iteration_bounds = array<i64: 2>, scalar_prefetch = 0 : i64, scratch_operands = 0 : i64, tpu.core_type = #tpu.core_type<tc>, window_params = [{transform_indices = @transform_0, window_bounds = array<i64: 32, 128>}, {pipeline_mode = #tpu.pipeline_mode<synchronous>, transform_indices = @transform_1, window_bounds = array<i64: 8, 32>}, {pipeline_mode = #tpu.pipeline_mode<synchronous>, transform_indices = @transform_2, window_bounds = array<i64: 264, 32>}, {pipeline_mode = #tpu.pipeline_mode<synchronous>, transform_indices = @transform_3, window_bounds = array<i64: 2, 8>}, {pipeline_mode = #tpu.pipeline_mode<synchronous>, transform_indices = @transform_4, window_bounds = array<i64: 2, 1>}, {transform_indices = @transform_5, window_bounds = array<i64: 2, 128>}]} {
    %c0 = arith.constant 0 : index
    %c0_0 = arith.constant 0 : index
    %0 = vector.load %arg1[%c0, %c0_0] : memref<32x128xf32, #tpu.memory_space<vmem>>, vector<32x128xf32>
    %1 = arith.mulf %0, %0 : vector<32x128xf32>
    %c0_1 = arith.constant 0 : index
    %c0_2 = arith.constant 0 : index
    %2 = vector.load %arg2[%c0_1, %c0_2] : memref<8x32xf32, #tpu.memory_space<vmem>>, vector<8x32xf32>
    %cst = arith.constant dense<0.000000e+00> : vector<8x128xf32>
    %3 = tpu.matmul %2, %1, %cst {dimension_numbers = #tpu.dot_dimension_numbers<[1], [0], [0], [1], [0, 0, 1, 1], [], []>} : vector<8x32xf32>, vector<32x128xf32>, vector<8x128xf32> -> vector<8x128xf32>
    %c0_3 = arith.constant 0 : index
    %c0_4 = arith.constant 0 : index
    %4 = vector.load %arg3[%c0_3, %c0_4] : memref<264x32xf32, #tpu.memory_space<vmem>>, vector<264x32xf32>
    %cst_5 = arith.constant dense<0.000000e+00> : vector<264x128xf32>
    %5 = tpu.matmul %4, %0, %cst_5 {dimension_numbers = #tpu.dot_dimension_numbers<[1], [0], [0], [1], [0, 0, 1, 1], [], []>} : vector<264x32xf32>, vector<32x128xf32>, vector<264x128xf32> -> vector<264x128xf32>
    %6 = vector.extract_strided_slice %5 {offsets = [0, 0], sizes = [256, 128], strides = [1, 1]} : vector<264x128xf32> to vector<256x128xf32>
    %7 = vector.extract_strided_slice %5 {offsets = [256, 0], sizes = [8, 128], strides = [1, 1]} : vector<264x128xf32> to vector<8x128xf32>
    %8 = arith.mulf %6, %6 : vector<256x128xf32>
    %9 = vector.shape_cast %8 : vector<256x128xf32> to vector<8x32x128xf32>
    %cst_6 = arith.constant dense<0.000000e+00> : vector<8x128xf32>
    %10 = vector.multi_reduction <add>, %9, %cst_6 [1] : vector<8x32x128xf32> to vector<8x128xf32>
    %11 = arith.addf %3, %7 : vector<8x128xf32>
    %12 = arith.subf %11, %10 : vector<8x128xf32>
    %cst_7 = arith.constant -5.000000e-01 : f32
    %13 = vector.broadcast %cst_7 : f32 to vector<8x128xf32>
    %14 = arith.mulf %13, %12 : vector<8x128xf32>
    %cst_8 = arith.constant dense<0xFF800000> : vector<128xf32>
    %15 = vector.multi_reduction <maximumf>, %14, %cst_8 [0] : vector<8x128xf32> to vector<128xf32>
    %16 = vector.shape_cast %15 : vector<128xf32> to vector<1x128xf32>
    %17 = vector.broadcast %16 : vector<1x128xf32> to vector<8x128xf32>
    %18 = arith.subf %14, %17 : vector<8x128xf32>
    %19 = math.exp %18 : vector<8x128xf32>
    %c0_9 = arith.constant 0 : index
    %c0_10 = arith.constant 0 : index
    %20 = vector.load %arg4[%c0_9, %c0_10] : memref<2x8xf32, #tpu.memory_space<vmem>>, vector<2x8xf32>
    %cst_11 = arith.constant dense<0.000000e+00> : vector<2x128xf32>
    %21 = tpu.matmul %20, %19, %cst_11 {dimension_numbers = #tpu.dot_dimension_numbers<[1], [0], [0], [1], [0, 0, 1, 1], [], []>} : vector<2x8xf32>, vector<8x128xf32>, vector<2x128xf32> -> vector<2x128xf32>
    %c0_12 = arith.constant 0 : index
    %c0_13 = arith.constant 0 : index
    %22 = vector.load %arg5[%c0_12, %c0_13] : memref<2x1xf32, #tpu.memory_space<vmem>>, vector<2x1xf32>
    %23 = vector.broadcast %22 : vector<2x1xf32> to vector<2x128xf32>
    %24 = vector.broadcast %16 : vector<1x128xf32> to vector<2x128xf32>
    %25 = arith.addf %23, %24 : vector<2x128xf32>
    %26 = math.log %21 : vector<2x128xf32>
    %27 = arith.addf %25, %26 : vector<2x128xf32>
    %c0_14 = arith.constant 0 : index
    %c0_15 = arith.constant 0 : index
    %28 = vector.load %arg6[%c0_14, %c0_15] : memref<2x128xf32, #tpu.memory_space<vmem>>, vector<2x128xf32>
    tpu.vector_store %arg6[%c0_14, %c0_15], %27 {strides = array<i32>} : memref<2x128xf32, #tpu.memory_space<vmem>>, vector<2x128xf32>,
    return
  }
  func.func @transform_0(%arg0: i32) -> (i32, i32) {
    %c0_i32 = arith.constant 0 : i32
    %c0_i32_0 = arith.constant 0 : i32
    return %c0_i32, %arg0 : i32, i32
  }
  func.func @transform_1(%arg0: i32) -> (i32, i32) {
    %c0_i32 = arith.constant 0 : i32
    %c0_i32_0 = arith.constant 0 : i32
    %c0_i32_1 = arith.constant 0 : i32
    return %c0_i32, %c0_i32_0 : i32, i32
  }
  func.func @transform_2(%arg0: i32) -> (i32, i32) {
    %c0_i32 = arith.constant 0 : i32
    %c0_i32_0 = arith.constant 0 : i32
    %c0_i32_1 = arith.constant 0 : i32
    return %c0_i32, %c0_i32_0 : i32, i32
  }
  func.func @transform_3(%arg0: i32) -> (i32, i32) {
    %c0_i32 = arith.constant 0 : i32
    %c0_i32_0 = arith.constant 0 : i32
    %c0_i32_1 = arith.constant 0 : i32
    return %c0_i32, %c0_i32_0 : i32, i32
  }
  func.func @transform_4(%arg0: i32) -> (i32, i32) {
    %c0_i32 = arith.constant 0 : i32
    %c0_i32_0 = arith.constant 0 : i32
    %c0_i32_1 = arith.constant 0 : i32
    return %c0_i32, %c0_i32_0 : i32, i32
  }
  func.func @transform_5(%arg0: i32) -> (i32, i32) {
    %c0_i32 = arith.constant 0 : i32
    %c0_i32_0 = arith.constant 0 : i32
    return %c0_i32, %arg0 : i32, i32
  }
}

</mosaic_0001>

<bundles_post_ra>
// kernel: tpu_custom_call.1
= control target key start
LH: loop header
LB: loop body
LE: loop exit
PB: predicated region body
PF: predicated region fallthrough
CT: control target
= control target key end

     0   :  { %10 = vsyncpa [#allocation4], 0  ;;  %s1262_s0 = inlined_call_operand.vmem [shape: f32[32,256], index: 0, kind: input, shape index: {}]   ;;  %s1263_s1 = inlined_call_operand.vmem [shape: f32[8,32], index: 1, kind: input, shape index: {}]   ;;  %s1264_s2 = inlined_call_operand.vmem [shape: f32[264,32], index: 2, kind: input, shape index: {}]   ;;  %s1265_s3 = inlined_call_operand.vmem [shape: f32[2,8], index: 3, kind: input, shape index: {}]   ;;  %s1266_s4 = inlined_call_operand.vmem [shape: f32[2,1], index: 4, kind: input, shape index: {}]   ;;  %s1267_s5 = inlined_call_operand.hbm [shape: f32[2,256], index: 5, kind: output, shape index: {}]  }
   0x1   :  { %12 = vsyncpa [#allocation4 + $0x1], 0  ;;  %s1005_s18 = smov 0   ;;  %s1007_s19 = smov 0  }
   0x2   :  { %s1009_s20 = smov 0   ;;  %s1011_s21 = smov 0  }
   0x3 LB: > { %s805_s22 = sadd.s32 4294967295, %s972_s21   ;;  %s806_s23 = sadd.s32 4294967294, %s972_s21   ;;  %s972_s21 = sphi %s1011_s21, %s1273_s21   ;;  %s968_s20 = sphi %s1009_s20, %s1272_s20   ;;  %s964_s19 = sphi %s1007_s19, %s1271_s19   ;;  %s960_s18 = sphi %s1005_s18, %s1270_s18  }
   0x4   : > { %s1028_s24 = sadd.s32 1, %s972_s21   ;;  %s25_s25 = sadd.s32 1, %s968_s20 }
   0x5   : > { %s22_s26 = ssub.s32 %s972_s21, %s1028_s24  ;;  %p32_p0 = scmp.ne.s32.totalorder %s968_s20, %s964_s19 }
   0x6   : > { %p23_p1 = scmp.eq.s32.totalorder %s22_s26, 0  ;;  %p33_p2 = scmp.eq.s32.totalorder %s972_s21, 0 }
   0x7   : > { %p146_p3 = scmp.eq.s32.totalorder %s805_s22, 1  ;;  %p151_p4 = scmp.ne.s32.totalorder %s964_s19, %s960_s18 }
   0x8   : > { %s1041_s27 = scalar_select %p23_p1, %s968_s20, %s25_s25  }
   0x9   : > { %p34_p5 = por %p33_p2, %p32_p0  ;;  %p1043_p6 = por %p146_p3, %p32_p0 }
   0xa   : > { %p152_p7 = scmp.eq.s32.totalorder %s806_s23, 1  ;;  %p808_p9 = scmp.ge.s32.totalorder %s972_s21, 2 }
   0xc   : > { %p1047_p8 = por %p152_p7, %p151_p4  ;;  %180 = sbr.rel (%p808_p9) target bundleno = 25 (0x19), region = 32 }
  0x11   : > { %183 = sbr.rel (!%p34_p5) target bundleno = 25 (0x19), region = 36  ;;  %s185_s30 = sand.u32 (%p34_p5), 1, %s968_s20  }
  0x12   : > { %s810_s6 = sshll.u32 (%p34_p5), %s972_s21, 3  ;;  %s809_s7 = sshll.u32 (%p34_p5), %s185_s30, 5 }
  0x13   : > { %s189_s10 = scalar_lea.vmem (%p34_p5), %s1262_s0, %s810_s6  ;;  %s187_s11 = scalar_lea.vmem (%p34_p5), [#allocation2], %s809_s7 }
  0x14   : > { %v224_v0 = vld [vmem:[%s189_s10] sm:$0xff] (%p34_p5)  ;;  %v226_v1 = vld [vmem:[%s189_s10 + $0x10] sm:$0xff] (%p34_p5) }
  0x15   : > { %v228_v2 = vld [vmem:[%s189_s10 + $0x20] sm:$0xff] (%p34_p5)  ;;  %225 = vst [vmem:[%s187_s11] sm:$0xff] (%p34_p5), %v224_v0  ;;  %v230_v3 = vld [vmem:[%s189_s10 + $0x30] sm:$0xff] (%p34_p5) }
  0x16   : > { %227 = vst [vmem:[%s187_s11 + $0x8] sm:$0xff] %v226_v1 }
  0x17   : > { %229 = vst [vmem:[%s187_s11 + $0x10] sm:$0xff] %v228_v2 }
  0x18   : > { %231 = vst [vmem:[%s187_s11 + $0x18] sm:$0xff] %v230_v3 }
  0x19 PF: > { %p811_p10 = scmp.ge.s32.totalorder %s972_s21, 1  ;;  %p236_p11 = scmp.lt.s32.totalorder %s972_s21, 3 }
  0x1b   : > { %p237_p12 = pnand %p811_p10, %p236_p11 }
  0x1c   : > { %s1062_s12 = sand.u32 (!%p237_p12), 1, %s964_s19   ;;  %s930_s8 = scalar_lea.hbm (!%p237_p12), %s1267_s5, 4 }
  0x1d   : > { %240 = sbr.rel (%p237_p12) target bundleno = 433 (0x1b1), region = 74  ;;  %s812_s13 = sshll.u32 (!%p237_p12), %s1062_s12, 5 }
  0x1e   : > { %s245_s14 = scalar_lea.vmem (!%p237_p12), [#allocation2], %s812_s13  ;;  %s813_s11 = sshll.u32 (!%p237_p12), %s1062_s12, 1 }
  0x1f   : > { %s850_s13 = sshll.u32 (!%p237_p12), %s805_s22, 1  ;;  %s269_s17 = scalar_lea.vmem (!%p237_p12), [#allocation3], %s813_s11 }
  0x20   : > { %s736_s16 = scalar_lea.hbm (!%p237_p12), %s1267_s5, %s850_s13  ;;  %s738_s23 = sshll.u32 (!%p237_p12), %s269_s17, 4  ;;  %s739_s23 = int_to_ptr.vmem [resolvable:$true] %s738_s23 }
  0x21   : > { %s740_s25 = sshll.u32 (!%p237_p12), %s736_s16, 4  ;;  %s726_s26 = scalar_lea.sflag (!%p237_p12), [#allocation4], %s1062_s12  ;;  %s741_s25 = int_to_ptr.hbm [resolvable:$true] %s740_s25 }
  0x22   : > { %v273_v4 = vld [vmem:[%s245_s14 + $0x18] sm:$0xff]  ;;  %v272_v5 = vld [vmem:[%s245_s14 + $0x10] sm:$0xff]  ;;  %v271_v6 = vld [vmem:[%s245_s14 + $0x8] sm:$0xff]  ;;  %vm312_vm0 = vcmask 261120   ;;  %v974_v32 = vmov 0   ;;  %vm663_vm1 = vcmask 1041409  }
  0x23   : > { %424 = vmatpush.msra.mxu0 %v273_v4  ;;  %853 = vmatpush.msra.mxu1 %v273_v4  ;;  %v1065_v7 = vld [vmem:[%s245_s14] sm:$0xff]  ;;  %v288_v9 = vld [vmem:[%s1264_s2 + $0x48] sm:$0xff]  ;;  %v289_v13 = vld [vmem:[%s1264_s2 + $0x50] sm:$0xff]  ;;  %v277_v28 = vmul.f32 %v273_v4, %v273_v4  ;;  %v276_v29 = vmul.f32 %v272_v5, %v272_v5  ;;  %v275_v31 = vmul.f32 %v271_v6, %v271_v6  ;;  %vm665_vm2 = vcmask 1042434   ;;  %s924_s30 = sshra.s32 %s741_s25, 4  ;;  %s925_s30 = int_to_ptr.hbm [resolvable:$true] %s924_s30 }
  0x24   : > { %854 = vmatpush.msra.mxu2 %v273_v4  ;;  %855 = vmatpush.msra.mxu3 %v273_v4  ;;  %v279_v8 = vld [vmem:[%s1264_s2] sm:$0xff]  ;;  %v280_v12 = vld [vmem:[%s1264_s2 + $0x8] sm:$0xff]  ;;  %v281_v16 = vld [vmem:[%s1264_s2 + $0x10] sm:$0xff]  ;;  %v274_v37 = vmul.f32 %v1065_v7, %v1065_v7  ;;  %vm667_vm3 = vcmask 1043459   ;;  %vm669_vm4 = vcmask 1044484   ;;  %vm671_vm5 = vcmask 1045509   ;;  %p931_p2 = scmp.lt.s32.totalorder %s925_s30, %s1267_s5 }
  0x25   : > { %425 = vmatpush.msra.mxu0 %v272_v5  ;;  %856 = vmatpush.msra.mxu1 %v272_v5  ;;  %v295_v10 = vld [vmem:[%s1264_s2 + $0x80] sm:$0xff]  ;;  %v296_v14 = vld [vmem:[%s1264_s2 + $0x88] sm:$0xff]  ;;  %v290_v17 = vld [vmem:[%s1264_s2 + $0x58] sm:$0xff]  ;;  %vm673_vm6 = vcmask 1046534   ;;  %vm675_vm7 = vcmask 1047559   ;;  %vm690_vm8 = vcmask 64512  }
  0x26   : > { %857 = vmatpush.msra.mxu2 %v272_v5  ;;  %858 = vmatpush.msra.mxu3 %v272_v5  ;;  %v303_v11 = vld [vmem:[%s1264_s2 + $0xc0] sm:$0xff]  ;;  %v304_v15 = vld [vmem:[%s1264_s2 + $0xc8] sm:$0xff]  ;;  %v297_v18 = vld [vmem:[%s1264_s2 + $0x90] sm:$0xff]  ;;  %s926_s22 = scalar_lea.hbm %s925_s30, 2 }
  0x27   : > { %426 = vmatpush.msra.mxu0 %v271_v6  ;;  %859 = vmatpush.msra.mxu1 %v271_v6  ;;  %v305_v19 = vld [vmem:[%s1264_s2 + $0xd0] sm:$0xff]  ;;  %v282_v20 = vld [vmem:[%s1264_s2 + $0x18] sm:$0xff]  ;;  %v291_v21 = vld [vmem:[%s1264_s2 + $0x60] sm:$0xff]  ;;  %p927_p13 = scmp.ne.s32.totalorder %s925_s30, %s926_s22  ;;  %p932_p3 = scmp.lt.s32.totalorder %s930_s8, %s926_s22 }
  0x28   : > { %860 = vmatpush.msra.mxu2 %v271_v6  ;;  %861 = vmatpush.msra.mxu3 %v271_v6  ;;  %v298_v22 = vld [vmem:[%s1264_s2 + $0x98] sm:$0xff]  ;;  %v283_v24 = vld [vmem:[%s1264_s2 + $0x20] sm:$0xff]  ;;  %v292_v25 = vld [vmem:[%s1264_s2 + $0x68] sm:$0xff] }
  0x29   : > { %427 = vmatpush.msra.mxu0 %v1065_v7  ;;  %862 = vmatpush.msra.mxu1 %v1065_v7  ;;  %v306_v23 = vld [vmem:[%s1264_s2 + $0xd8] sm:$0xff]  ;;  %v299_v26 = vld [vmem:[%s1264_s2 + $0xa0] sm:$0xff]  ;;  %v284_v33 = vld [vmem:[%s1264_s2 + $0x28] sm:$0xff]  ;;  %p928_p0 = pnand %p927_p13, %p1043_p6  ;;  %p933_p4 = por %p932_p3, %p931_p2 }
  0x2a   : > { %863 = vmatpush.msra.mxu2 %v1065_v7  ;;  %864 = vmatpush.msra.mxu3 %v1065_v7  ;;  %v307_v27 = vld [vmem:[%s1264_s2 + $0xe0] sm:$0xff]  ;;  %v293_v34 = vld [vmem:[%s1264_s2 + $0x70] sm:$0xff]  ;;  %v300_v35 = vld [vmem:[%s1264_s2 + $0xa8] sm:$0xff] }
  0x2b   : > { %814 = vmatmul.msk.f32.vlgmr.msra.gmra.mxu0 %vm312_vm0, %v279_v8  ;;  %823 = vmatmul.msk.f32.vlgmr.msra.gmra.mxu1 %vm312_vm0, %v288_v9  ;;  %v714_v30 = vld [vmem:[%s1266_s4] sm:$0x3]  ;;  %v308_v36 = vld [vmem:[%s1264_s2 + $0xe8] sm:$0xff]  ;;  %v285_v38 = vld [vmem:[%s1264_s2 + $0x30] sm:$0xff]  ;;  %p929_p1 = pneg %p928_p0 }
  0x2c   : > { %830 = vmatmul.msk.f32.vlgmr.msra.gmra.mxu2 %vm312_vm0, %v295_v10  ;;  %838 = vmatmul.msk.f32.vlgmr.msra.gmra.mxu3 %vm312_vm0, %v303_v11  ;;  %v294_v39 = vld [vmem:[%s1264_s2 + $0x78] sm:$0xff]  ;;  %v301_v40 = vld [vmem:[%s1264_s2 + $0xb0] sm:$0xff]  ;;  %v278_v43 = vld [vmem:[%s1263_s1] sm:$0xff] }
  0x2d   : > { %647 = vmatpush.msrb.mxu1 %v277_v28  ;;  %905 = vset.pattern.permute.xlu0 %v974_v32  ;;  %v309_v41 = vld [vmem:[%s1264_s2 + $0xf0] sm:$0xff]  ;;  %v286_v42 = vld [vmem:[%s1264_s2 + $0x38] sm:$0xff]  ;;  %v287_v46 = vld [vmem:[%s1264_s2 + $0x40] sm:$0xff]  ;;  %p934_p5 = pnand %p933_p4, %p929_p1 }
  0x2e   : > { %717 = vperm.xlu0 %905, %v714_v30   ;;  %v302_v44 = vld [vmem:[%s1264_s2 + $0xb8] sm:$0xff]  ;;  %v311_v47 = vld [vmem:[%s1264_s2 + $0x100] sm:$0xff] }
  0x2f   : > { %648 = vmatpush.msrb.mxu1 %v276_v29  ;;  %v310_v45 = vld [vmem:[%s1264_s2 + $0xf8] sm:$0xff] }
  0x31   : > { %649 = vmatpush.msrb.mxu1 %v275_v31 }
  0x33   : > { %815 = vmatmul.msk.f32.gmra.mxu0 %vm312_vm0, %v280_v12  ;;  %824 = vmatmul.msk.f32.gmra.mxu1 %vm312_vm0, %v289_v13 }
  0x34   : > { %831 = vmatmul.msk.f32.gmra.mxu2 %vm312_vm0, %v296_v14  ;;  %839 = vmatmul.msk.f32.gmra.mxu3 %vm312_vm0, %v304_v15 }
  0x35   : > { %650 = vmatpush.msrb.mxu1 %v274_v37 }
  0x3b   : > { %816 = vmatmul.msk.f32.gmra.mxu0 %vm312_vm0, %v281_v16  ;;  %825 = vmatmul.msk.f32.gmra.mxu1 %vm312_vm0, %v290_v17 }
  0x3c   : > { %832 = vmatmul.msk.f32.gmra.mxu2 %vm312_vm0, %v297_v18  ;;  %840 = vmatmul.msk.f32.gmra.mxu3 %vm312_vm0, %v305_v19 }
  0x43   : > { %817 = vmatmul.msk.f32.gmra.mxu0 %vm312_vm0, %v282_v20  ;;  %826 = vmatmul.msk.f32.gmra.mxu1 %vm312_vm0, %v291_v21 }
  0x44   : > { %833 = vmatmul.msk.f32.gmra.mxu2 %vm312_vm0, %v298_v22  ;;  %841 = vmatmul.msk.f32.gmra.mxu3 %vm312_vm0, %v306_v23 }
  0x4b   : > { %818 = vmatmul.msk.f32.gmra.mxu0 %vm312_vm0, %v283_v24  ;;  %827 = vmatmul.msk.f32.gmra.mxu1 %vm312_vm0, %v292_v25 }
  0x4c   : > { %834 = vmatmul.msk.f32.gmra.mxu2 %vm312_vm0, %v299_v26  ;;  %842 = vmatmul.msk.f32.gmra.mxu3 %vm312_vm0, %v307_v27 }
  0x53   : > { %819 = vmatmul.msk.f32.gmra.mxu0 %vm312_vm0, %v284_v33  ;;  %828 = vmatmul.msk.f32.gmra.mxu1 %vm312_vm0, %v293_v34 }
  0x54   : > { %835 = vmatmul.msk.f32.gmra.mxu2 %vm312_vm0, %v300_v35  ;;  %843 = vmatmul.msk.f32.gmra.mxu3 %vm312_vm0, %v308_v36 }
  0x5b   : > { %820 = vmatmul.msk.f32.gmra.mxu0 %vm312_vm0, %v285_v38  ;;  %829 = vmatmul.msk.f32.gmra.mxu1 %vm312_vm0, %v294_v39 }
  0x5c   : > { %836 = vmatmul.msk.f32.gmra.mxu2 %vm312_vm0, %v301_v40  ;;  %844 = vmatmul.msk.f32.gmra.mxu3 %vm312_vm0, %v309_v41 }
  0x63   : > { %821 = vmatmul.msk.f32.gmra.mxu0 %vm312_vm0, %v286_v42  ;;  %847 = vmatmul.msk.f32.vlgmr.msrb.gmra.mxu1 %vm312_vm0, %v278_v43 }
  0x64   : > { %837 = vmatmul.msk.f32.gmra.mxu2 %vm312_vm0, %v302_v44  ;;  %845 = vmatmul.msk.f32.gmra.mxu3 %vm312_vm0, %v310_v45 }
  0x6b   : > { %822 = vmatmul.msk.f32.gmra.mxu0 %vm312_vm0, %v287_v46 }
  0x6c   : > { %846 = vmatmul.msk.f32.gmra.mxu3 %vm312_vm0, %v311_v47 }
  0xa8   : > { %v429_v48 = vpop.f32.mrf.mxu0  ;;  %v1212_v49 = vpop.f32.mrf.mxu1 }
  0xa9   : > { %v528_v17 = vmul.f32 %v429_v48, %v429_v48 }
  0xaf   : > { %v477_v50 = vpop.f32.mrf.mxu2  ;;  %v501_v51 = vpop.f32.mrf.mxu3 }
  0xb0   : > { %v432_v52 = vpop.f32.mrf.mxu0  ;;  %v1214_v53 = vpop.f32.mrf.mxu1  ;;  %v544_v11 = vmul.f32 %v477_v50, %v477_v50  ;;  %v552_v18 = vmul.f32 %v501_v51, %v501_v51 }
  0xb1   : > { %v529_v12 = vmul.f32 %v432_v52, %v432_v52 }
  0xb3   : > { %v560_v24 = vadd.f32 %v529_v12, %v528_v17  ;;  %v538_v12 = vmul.f32 %v1214_v53, %v1214_v53 }
  0xb7   : > { %v480_v54 = vpop.f32.mrf.mxu2  ;;  %v504_v55 = vpop.f32.mrf.mxu3 }
  0xb8   : > { %v435_v56 = vpop.f32.mrf.mxu0  ;;  %v1216_v57 = vpop.f32.mrf.mxu1  ;;  %v545_v13 = vmul.f32 %v480_v54, %v480_v54  ;;  %v553_v19 = vmul.f32 %v504_v55, %v504_v55 }
  0xb9   : > { %v530_v20 = vmul.f32 %v435_v56, %v435_v56 }
  0xba   : > { %v596_v27 = vadd.f32 %v545_v13, %v544_v11  ;;  %v614_v33 = vadd.f32 %v553_v19, %v552_v18  ;;  %v539_v19 = vmul.f32 %v1216_v57, %v1216_v57 }
  0xbb   : > { %v561_v34 = vadd.f32 %v560_v24, %v530_v20 }
  0xbf   : > { %v483_v58 = vpop.f32.mrf.mxu2  ;;  %v507_v59 = vpop.f32.mrf.mxu3 }
  0xc0   : > { %v438_v60 = vpop.f32.mrf.mxu0  ;;  %v465_v61 = vpop.f32.mrf.mxu1  ;;  %v546_v25 = vmul.f32 %v483_v58, %v483_v58  ;;  %v554_v35 = vmul.f32 %v507_v59, %v507_v59 }
  0xc1   : > { %v540_v6 = vmul.f32 %v465_v61, %v465_v61  ;;  %v531_v26 = vmul.f32 %v438_v60, %v438_v60 }
  0xc2   : > { %v597_v42 = vadd.f32 %v596_v27, %v546_v25  ;;  %v615_v52 = vadd.f32 %v614_v33, %v554_v35 }
  0xc3   : > { %v562_v43 = vadd.f32 %v561_v34, %v531_v26 }
  0xc5   : > { %v563_v58 = vrot.slane %v562_v43, 4 }
  0xc7   : > { %v486_v62 = vpop.f32.mrf.mxu2  ;;  %v510_v63 = vpop.f32.mrf.mxu3 }
  0xc8   : > { %v441_v0 = vpop.f32.mrf.mxu0  ;;  %v468_v1 = vpop.f32.mrf.mxu1  ;;  %v547_v36 = vmul.f32 %v486_v62, %v486_v62  ;;  %v555_v46 = vmul.f32 %v510_v63, %v510_v63 }
  0xc9   : > { %v541_v7 = vmul.f32 %v468_v1, %v468_v1  ;;  %v532_v22 = vmul.f32 %v441_v0, %v441_v0 }
  0xca   : > { %v598_v54 = vadd.f32 %v597_v42, %v547_v36  ;;  %v616_v60 = vadd.f32 %v615_v52, %v555_v46 }
  0xcb   : > { %v587_v14 = vadd.f32 %v541_v7, %v540_v6  ;;  %v537_v6 = vmul.f32 %v1212_v49, %v1212_v49 }
  0xcc   : > { %v599_v7 = vrot.slane %v598_v54, 4  ;;  %v617_v13 = vrot.slane %v616_v60, 4 }
  0xce   : > { %v600_v20 = vadd.f32 %v599_v7, %v598_v54 }
  0xcf   : > { %v489_v2 = vpop.f32.mrf.mxu2  ;;  %v513_v3 = vpop.f32.mrf.mxu3 }
  0xd0   : > { %v444_v4 = vpop.f32.mrf.mxu0  ;;  %v471_v5 = vpop.f32.mrf.mxu1  ;;  %v548_v38 = vmul.f32 %v489_v2, %v489_v2  ;;  %v556_v44 = vmul.f32 %v513_v3, %v513_v3 }
  0xd1   : > { %v533_v15 = vmul.f32 %v444_v4, %v444_v4  ;;  %v542_v16 = vmul.f32 %v471_v5, %v471_v5 }
  0xd3   : > { %v569_v28 = vadd.f32 %v533_v15, %v532_v22  ;;  %v588_v29 = vadd.f32 %v587_v14, %v542_v16 }
  0xd7   : > { %v492_v8 = vpop.f32.mrf.mxu2  ;;  %v516_v9 = vpop.f32.mrf.mxu3 }
  0xd8   : > { %v447_v10 = vpop.f32.mrf.mxu0  ;;  %v474_v21 = vpop.f32.mrf.mxu1  ;;  %v549_v39 = vmul.f32 %v492_v8, %v492_v8  ;;  %v557_v45 = vmul.f32 %v516_v9, %v516_v9  ;;  %v564_v9 = vadd.f32 %v563_v58, %v562_v43 }
  0xd9   : > { %v534_v23 = vmul.f32 %v447_v10, %v447_v10  ;;  %v543_v30 = vmul.f32 %v474_v21, %v474_v21 }
  0xda   : > { %v605_v55 = vadd.f32 %v549_v39, %v548_v38  ;;  %v623_v59 = vadd.f32 %v557_v45, %v556_v44  ;;  %v565_v49 = vrot.slane %v564_v9, 2 }
  0xdb   : > { %v570_v40 = vadd.f32 %v569_v28, %v534_v23  ;;  %v589_v47 = vadd.f32 %v588_v29, %v543_v30  ;;  %v618_v23 = vadd.f32 %v617_v13, %v616_v60  ;;  %v601_v28 = vrot.slane %v600_v20, 2 }
  0xdc   : > { %v566_v29 = vadd.f32 %v565_v49, %v564_v9 }
  0xdd   : > { %v590_v61 = vrot.slane %v589_v47, 4  ;;  %v602_v36 = vadd.f32 %v601_v28, %v600_v20 }
  0xdf   : > { %v495_v31 = vpop.f32.mrf.mxu2  ;;  %v519_v32 = vpop.f32.mrf.mxu3  ;;  %v591_v15 = vadd.f32 %v590_v61, %v589_v47  ;;  %v603_v44 = vrot.slane %v602_v36, 1 }
  0xe0   : > { %v450_v37 = vpop.f32.mrf.mxu0  ;;  %v550_v48 = vmul.f32 %v495_v31, %v495_v31  ;;  %v558_v51 = vmul.f32 %v519_v32, %v519_v32  ;;  %v619_v31 = vrot.slane %v618_v23, 2 }
  0xe1   : > { %v535_v41 = vmul.f32 %v450_v37, %v450_v37  ;;  %v592_v25 = vrot.slane %v591_v15, 2  ;;  %v567_v37 = vrot.slane %v566_v29, 1  ;;  %v604_v58 = vadd.f32 %v603_v44, %v602_v36 }
  0xe2   : > { %v606_v62 = vadd.f32 %v605_v55, %v550_v48  ;;  %v624_v2 = vadd.f32 %v623_v59, %v558_v51  ;;  %v620_v39 = vadd.f32 %v619_v31, %v618_v23 }
  0xe3   : > { %v571_v50 = vadd.f32 %v570_v40, %v535_v41  ;;  %v593_v33 = vadd.f32 %v592_v25, %v591_v15  ;;  %v568_v46 = vadd.f32 %v567_v37, %v566_v29  ;;  %v689_v15 = vld [vmem:[%s1265_s3] sm:$0x3] }
  0xe4   : > { %v621_v48 = vrot.slane %v620_v39, 1 }
  0xe5   : > { %v572_v56 = vrot.slane %v571_v50, 4  ;;  %v594_v41 = vrot.slane %v593_v33, 1 }
  0xe7   : > { %v498_v0 = vpop.f32.mrf.mxu2  ;;  %v522_v1 = vpop.f32.mrf.mxu3  ;;  %v573_v4 = vadd.f32 %v572_v56, %v571_v50  ;;  %v595_v51 = vadd.f32 %v594_v41, %v593_v33 }
  0xe8   : > { %v551_v3 = vmul.f32 %v498_v0, %v498_v0  ;;  %v559_v5 = vmul.f32 %v522_v1, %v522_v1  ;;  %v453_v63 = vpop.f32.mrf.mxu0  ;;  %v652_v56 = vpop.f32.mrf.mxu1 }
  0xe9   : > { %v536_v8 = vmul.f32 %v453_v63, %v453_v63  ;;  %v574_v16 = vrot.slane %v573_v4, 2 }
  0xea   : > { %v607_v10 = vadd.f32 %v606_v62, %v551_v3  ;;  %v625_v11 = vadd.f32 %v624_v2, %v559_v5  ;;  %v622_v62 = vadd.f32 %v621_v48, %v620_v39 }
  0xeb   : > { %v578_v14 = vadd.f32 %v537_v6, %v536_v8  ;;  %v575_v26 = vadd.f32 %v574_v16, %v573_v4 }
  0xec   : > { %v608_v17 = vrot.slane %v607_v10, 4  ;;  %v626_v18 = vrot.slane %v625_v11, 4 }
  0xed   : > { %v579_v21 = vadd.f32 %v578_v14, %v538_v12  ;;  %v576_v34 = vrot.slane %v575_v26, 1 }
  0xee   : > { %v609_v22 = vadd.f32 %v608_v17, %v607_v10  ;;  %v627_v27 = vadd.f32 %v626_v18, %v625_v11  ;;  %v718_v18 = vpop.permute.xlu0 %717 }
  0xef   : > { %v580_v24 = vadd.f32 %v579_v21, %v539_v19  ;;  %v577_v42 = vadd.f32 %v576_v34, %v575_v26  ;;  %v525_v55 = vpop.f32.mrf.mxu3 }
  0xf0   : > { %v610_v30 = vrot.slane %v609_v22, 2  ;;  %v628_v35 = vrot.slane %v627_v27, 2  ;;  %v653_v0 = vadd.f32 %v652_v56, %v525_v55 }
  0xf1   : > { %v581_v53 = vrot.slane %v580_v24, 4  ;;  %v664_v52 = vsel %vm663_vm1, %v577_v42, %v568_v46 }
  0xf2   : > { %v611_v38 = vadd.f32 %v610_v30, %v609_v22  ;;  %v629_v43 = vadd.f32 %v628_v35, %v627_v27 }
  0xf3   : > { %v582_v32 = vadd.f32 %v581_v53, %v580_v24 }
  0xf4   : > { %v612_v47 = vrot.slane %v611_v38, 1  ;;  %v630_v54 = vrot.slane %v629_v43, 1 }
  0xf5   : > { %v583_v57 = vrot.slane %v582_v32, 2 }
  0xf6   : > { %v613_v60 = vadd.f32 %v612_v47, %v611_v38  ;;  %v631_v2 = vadd.f32 %v630_v54, %v629_v43 }
  0xf7   : > { %v584_v40 = vadd.f32 %v583_v57, %v582_v32 }
  0xf9   : > { %v585_v45 = vrot.slane %v584_v40, 1 }
  0xfb   : > { %v586_v50 = vadd.f32 %v585_v45, %v584_v40 }
  0xfd   : > { %v666_v59 = vsel %vm665_vm2, %v586_v50, %v664_v52 }
  0xfe   : > { %v668_v61 = vsel %vm667_vm3, %v595_v51, %v666_v59 }
  0xff   : > { %v670_v1 = vsel %vm669_vm4, %v604_v58, %v668_v61 }
 0x100   : > { %v672_v4 = vsel %vm671_vm5, %v613_v60, %v670_v1 }
 0x101   : > { %v674_v3 = vsel %vm673_vm6, %v622_v62, %v672_v4 }
 0x102   : > { %v676_v5 = vsel %vm675_vm7, %v631_v2, %v674_v3 }
 0x103   : > { %v678_v63 = vsub.f32 %v653_v0, %v676_v5 }
 0x105   : > { %v679_v6 = vmul.f32 -0.5, %v678_v63 }
 0x107   : > { %v680_v7 = vrot.slane %v679_v6, 4 }
 0x109   : > { %v681_v8 = vmax.f32 %v679_v6, %v680_v7 }
 0x10b   : > { %v682_v9 = vrot.slane %v681_v8, 2 }
 0x10d   : > { %v683_v10 = vmax.f32 %v681_v8, %v682_v9 }
 0x10f   : > { %v684_v11 = vrot.slane %v683_v10, 1 }
 0x111   : > { %v685_v12 = vmax.f32 %v683_v10, %v684_v11 }
 0x113   : > { %v686_v13 = vsub.f32 %v679_v6, %v685_v12  ;;  %v720_v20 = vadd.f32 %v718_v18, %v685_v12 }
 0x115   : > { %v687_v14 = vmul.f32 1.442695, %v686_v13 }
 0x117   : > { %906 = vpow2.f32 %v687_v14 }
 0x11d   : > { %v907_v16 = vpop.eup %906 }
 0x11e   : > { %709 = vmatpush.msrb.mxu2 %v907_v16 }
 0x11f   : > { %848 = vmatmul.msk.f32.vlgmr.msrb.gmra.mxu2 %vm690_vm8, %v689_v15 }
 0x1a2   : > { %v711_v17 = vpop.f32.mrf.mxu2 }
 0x1a3   : > { %908 = vlog2.f32 %v711_v17 }
 0x1a9   : > { %v909_v19 = vpop.eup %908 }
 0x1aa   : > { %v722_v21 = vmul.f32 0.6931472, %v909_v19 }
 0x1ac   : > { %v723_v49 = vadd.f32 %v722_v21, %v720_v20 }
 0x1ae   : > { %724 = vst [vmem:[%s269_s17] sm:$0x3] %v723_v49 }
 0x1af   : > { %937 = shalt.err (!%p934_p5)
}
 0x1b0   : > { %865 = dma.vmem_to_hbm [thread:$0]  (%p1043_p6), %s739_s23, 32, %s741_s25, %s726_s26  }
 0x1b1 PF: > { %s752_s12 = sand.u32 1, %s960_s18   ;;  %p868_p7 = pnand %p808_p9, %p1047_p8 }
 0x1b2   : > { %s753_s11 = scalar_lea.sflag [#allocation4], %s752_s12 }
 0x1b3   : > { %p869_p10 = pneg %p868_p7 }
 0x1b5   : > { %955 = dma.done.wait (%p869_p10), %s753_s11, 32  }
 0x1b6   : > { %957 = vsyncadd (%p869_p10), %s753_s11, 4294967264  ;;  %p15_p11 = scmp.ge.s32.totalorder %s1028_s24, 4   ;;  %s1270_s18 = smov %s964_s19 }
 0x1b7   : > { %s1271_s19 = smov %s968_s20  ;;  %s1272_s20 = smov %s1041_s27 }
 0x1b8   : > { %s1273_s21 = smov %s1028_s24  ;;  %17 = sbr.rel (!%p15_p11) target bundleno = 3 (0x3), region = 118 }
 0x1bd   :  { %759 = vsyncpa [#allocation4], 1 }
 0x1be   :  { %761 = vsyncpa [#allocation4 + $0x1], 1 }

</bundles_post_ra>
